<compile_context>
chip_gen: v7x
topology: tpu7x:2x2x1
jax: 0.10.0
libtpu: 0.0.40
codegen_flags: <defaults>
</compile_context>

<pallas_src>
import functools

import jax
import jax.numpy as jnp
from jax.experimental import pallas as pl
from jax.experimental.pallas import tpu as pltpu


def _round_up(x, m):
    return (x + m - 1) // m * m


def _conv_stats_kernel(p_ref, w_ref, y_ref, stats_ref):
    # p_ref:     (G, K, TM)      bf16 patches for this M tile
    # w_ref:     (G, Cout_g, K)  bf16 weights (resident across M tiles)
    # y_ref:     (Cout, TM)      f32 un-normalized conv output (lane-dense store)
    # stats_ref: (1, Cout, 2)    f32 [sum, sum_sq] accumulator, resident across
    #                            the M-tile ("arbitrary") axis, one per chunk.
    mt = pl.program_id(1)

    @pl.when(mt == 0)
    def _():
        stats_ref[...] = jnp.zeros_like(stats_ref)

    G = w_ref.shape[0]
    ys = []
    for g in range(G):  # static unroll over groups -> stacked sublane-dense output
        ys.append(jnp.dot(w_ref[g], p_ref[g], preferred_element_type=jnp.float32))
    y = jnp.concatenate(ys, axis=0)                      # [Cout, TM] f32
    y_ref[...] = y

    ssum = jnp.sum(y, axis=1, keepdims=True)             # [Cout, 1]
    ssq = jnp.sum(y * y, axis=1, keepdims=True)          # [Cout, 1]
    stats_ref[...] += jnp.concatenate([ssum, ssq], axis=1)[None]


def _bn_apply_kernel(y_ref, stats_ref, gamma_ref, beta_ref, o_ref, *, m_true, eps):
    # y_ref: (Cout, TM) f32; stats_ref: (Cout, 2); gamma/beta: (Cout, 1)
    y = y_ref[...]
    s = stats_ref[...]
    inv_m = 1.0 / m_true
    mean = s[:, 0:1] * inv_m                              # [Cout, 1]
    var = s[:, 1:2] * inv_m - mean * mean                 # biased variance
    inv_std = jax.lax.rsqrt(var + eps)
    scale = gamma_ref[...] * inv_std
    shift = beta_ref[...] - mean * scale
    o_ref[...] = (y * scale + shift).astype(o_ref.dtype)


def conv_bn_2d_groups(x, weight, gamma, beta, *, kernel_size=3, padding=1,
                      dilation=1, stride=1, groups=1, eps=1e-5, block_m=512):
    """x: [N, Cin, H, W] (NCHW). weight: [Cout, Cin//groups, KH, KW]."""
    N, Cin, H, W = x.shape
    Cout, Cin_g, KH, KW = weight.shape
    assert Cin_g == Cin // groups and Cout % groups == 0
    G = groups
    Cout_g = Cout // G

    OH = (H + 2 * padding - dilation * (KH - 1) - 1) // stride + 1
    OW = (W + 2 * padding - dilation * (KW - 1) - 1) // stride + 1
    M = N * OH * OW
    K = Cin_g * KH * KW

    # ---- M tile / parallel-chunk selection (VMEM-budgeted, multiple of 128) ----
    tm = max(128, _round_up(min(block_m, M), 128))

    def est_bytes(t):  # double-buffered patch + y tiles (dominant VMEM users)
        k_pad = _round_up(K, 8)
        c_pad = _round_up(Cout, 8)
        return 2 * (G * k_pad * t * 2 + c_pad * t * 4)

    while tm > 128 and est_bytes(tm) > 24 * 2**20:
        tm -= 128
    n_tiles = -(-M // tm)
    n_par = 2 if n_tiles >= 2 else 1      # keep both v7x TensorCores busy
    n_mt = -(-n_tiles // n_par)
    M_pad = n_par * n_mt * tm
    vmem_limit = int(min(32 * 2**20, max(4 * 2**20, 2 * est_bytes(tm))))

    # ---- im2col -> [G, K, M] (K on sublanes, flattened M on lanes), bf16 ----
    x_pad = jnp.pad(x, ((0, 0), (0, 0), (padding, padding), (padding, padding)))
    views = []
    for kh in range(KH):
        for kw in range(KW):
            h0 = kh * dilation
            w0 = kw * dilation
            views.append(
                x_pad[:, :, h0:h0 + (OH - 1) * stride + 1:stride,
                            w0:w0 + (OW - 1) * stride + 1:stride])
    p = jnp.stack(views, axis=0).reshape(KH, KW, N, G, Cin_g, OH, OW)
    # single transpose to (G, Cin_g, KH, KW, N, OH, OW) -> [G, K, M]
    p = p.transpose(3, 4, 0, 1, 2, 5, 6).reshape(G, K, M)
    # zero-pad M (zero patches -> zero conv output -> BN sums unaffected)
    p = jnp.pad(p, ((0, 0), (0, 0), (0, M_pad - M))).astype(jnp.bfloat16)

    w = weight.reshape(G, Cout_g, K).astype(jnp.bfloat16)      # K order matches p
    gamma_c = gamma.reshape(Cout, 1).astype(jnp.float32)
    beta_c = beta.reshape(Cout, 1).astype(jnp.float32)

    # ---- kernel 1: grouped conv (bf16 MXU, f32 acc) + streaming BN stats ----
    y_full, stats = pl.pallas_call(
        _conv_stats_kernel,
        out_shape=(jax.ShapeDtypeStruct((Cout, M_pad), jnp.float32),
                   jax.ShapeDtypeStruct((n_par, Cout, 2), jnp.float32)),
        grid_spec=pltpu.PrefetchScalarGridSpec(
            num_scalar_prefetch=0,
            grid=(n_par, n_mt),
            in_specs=[
                pl.BlockSpec((G, K, tm), lambda par, mt: (0, 0, par * n_mt + mt)),
                # weights ignore the M-tile index -> DMA'd once, stay resident
                pl.BlockSpec((G, Cout_g, K), lambda par, mt: (0, 0, 0)),
            ],
            out_specs=[
                pl.BlockSpec((Cout, tm), lambda par, mt: (0, par * n_mt + mt)),
                pl.BlockSpec((1, Cout, 2), lambda par, mt: (par, 0, 0)),
            ],
        ),
        compiler_params=pltpu.CompilerParams(
            dimension_semantics=("parallel", "arbitrary"),
            vmem_limit_bytes=vmem_limit),
        cost_estimate=pl.CostEstimate(
            flops=2 * M_pad * K * Cout,
            transcendentals=0,
            bytes_accessed=int(p.size * 2 + w.size * 2
                               + Cout * M_pad * 4 + n_par * Cout * 2 * 4)),
    )(p, w)

    # combine per-chunk partial sums (tiny [n_par, Cout, 2] reduction)
    stats_total = jnp.sum(stats, axis=0)                       # [Cout, 2]

    # ---- kernel 2: apply BatchNorm (training-mode batch stats) ----
    bn_kernel = functools.partial(_bn_apply_kernel, m_true=float(M), eps=float(eps))
    out_full = pl.pallas_call(
        bn_kernel,
        out_shape=jax.ShapeDtypeStruct((Cout, M_pad), x.dtype),
        grid_spec=pltpu.PrefetchScalarGridSpec(
            num_scalar_prefetch=0,
            grid=(n_par * n_mt,),
            in_specs=[
                pl.BlockSpec((Cout, tm), lambda i: (0, i)),
                pl.BlockSpec((Cout, 2), lambda i: (0, 0)),
                pl.BlockSpec((Cout, 1), lambda i: (0, 0)),
                pl.BlockSpec((Cout, 1), lambda i: (0, 0)),
            ],
            out_specs=pl.BlockSpec((Cout, tm), lambda i: (0, i)),
        ),
        compiler_params=pltpu.CompilerParams(
            dimension_semantics=("parallel",),
            vmem_limit_bytes=vmem_limit),
    )(y_full, stats_total, gamma_c, beta_c)

    # [Cout, M] -> [N, Cout, OH, OW] (NCHW)
    out = out_full[:, :M].reshape(Cout, N, OH, OW).transpose(1, 0, 2, 3)
    return out


def _reference(x, weight, gamma, beta, *, padding, stride, dilation, groups, eps):
    y = jax.lax.conv_general_dilated(
        x, weight,
        window_strides=(stride, stride),
        padding=((padding, padding), (padding, padding)),
        rhs_dilation=(dilation, dilation),
        dimension_numbers=("NCHW", "OIHW", "NCHW"),
        feature_group_count=groups,
        precision=jax.lax.Precision.HIGHEST)
    mean = jnp.mean(y, axis=(0, 2, 3), keepdims=True)
    var = jnp.mean((y - mean) ** 2, axis=(0, 2, 3), keepdims=True)
    return (y - mean) * jax.lax.rsqrt(var + eps) * gamma.reshape(1, -1, 1, 1) \
        + beta.reshape(1, -1, 1, 1)


if __name__ == "__main__":
    # Small shapes consistent with the module: N=2, Cin=4, H=W=16,
    # Cout=8, kernel=3, padding=1, stride=1, dilation=1, groups=2.
    N, Cin, H, W = 2, 4, 16, 16
    Cout, KH, KW = 8, 3, 3
    groups = 2

    key = jax.random.PRNGKey(0)
    kx, kw = jax.random.split(key)
    x = jax.random.normal(kx, (N, Cin, H, W), dtype=jnp.float32)
    weight = jax.random.normal(kw, (Cout, Cin // groups, KH, KW),
                               dtype=jnp.float32) * 0.1
    gamma = jnp.ones((Cout,), dtype=jnp.float32)   # BN weight init (PyTorch default)
    beta = jnp.zeros((Cout,), dtype=jnp.float32)   # BN bias init (PyTorch default)

    # block_m=128 so the test exercises the M tiling, the cross-tile stats
    # accumulation, and the parallel-chunk combine (M=512 -> 2 chunks x 2 tiles).
    out = conv_bn_2d_groups(x, weight, gamma, beta,
                            kernel_size=3, padding=1, dilation=1,
                            stride=1, groups=groups, eps=1e-5, block_m=128)
    out = jax.block_until_ready(out)

    ref = _reference(x, weight, gamma, beta, padding=1, stride=1,
                     dilation=1, groups=groups, eps=1e-5)
    assert out.shape == (N, Cout, H, W)
    # bf16 matmul inputs (f32 accumulation) vs f32 HIGHEST reference -> loosened tol
    assert jnp.max(jnp.abs(out - ref)) < 5e-2

    print("KERNEL_OK")
</pallas_src>

<mosaic_0001>
module attributes {stable_mosaic.version = 11 : i64} {
  func.func @_conv_stats_kernel(%arg0: i32, %arg1: i32, %arg2: memref<2x18x128xbf16, #tpu.memory_space<vmem>>, %arg3: memref<2x4x18xbf16, #tpu.memory_space<vmem>>, %arg4: memref<8x128xf32, #tpu.memory_space<vmem>>, %arg5: memref<1x8x2xf32, #tpu.memory_space<vmem>>) attributes {dimension_semantics = [#tpu.dimension_semantics<parallel>, #tpu.dimension_semantics<arbitrary>], iteration_bounds = array<i64: 2, 2>, scalar_prefetch = 0 : i64, scratch_operands = 0 : i64, tpu.core_type = #tpu.core_type<tc>, window_params = [{transform_indices = @transform_0, window_bounds = array<i64: 2, 18, 128>}, {pipeline_mode = #tpu.pipeline_mode<synchronous>, transform_indices = @transform_1, window_bounds = array<i64: 2, 4, 18>}, {transform_indices = @transform_2, window_bounds = array<i64: 8, 128>}, {transform_indices = @transform_3, window_bounds = array<i64: 1, 8, 2>}]} {
    %c0_i32 = arith.constant 0 : i32
    %0 = arith.cmpi eq, %arg1, %c0_i32 : i32
    %1 = arith.extui %0 : i1 to i32
    %c0_i32_0 = arith.constant 0 : i32
    %2 = arith.cmpi ne, %1, %c0_i32_0 : i32
    scf.if %2 {
      %cst_22 = arith.constant 0.000000e+00 : f32
      %25 = vector.broadcast %cst_22 : f32 to vector<1x8x2xf32>
      %c0_23 = arith.constant 0 : index
      %c0_24 = arith.constant 0 : index
      %c0_25 = arith.constant 0 : index
      %26 = vector.load %arg5[%c0_23, %c0_24, %c0_25] : memref<1x8x2xf32, #tpu.memory_space<vmem>>, vector<1x8x2xf32>
      tpu.vector_store %arg5[%c0_23, %c0_24, %c0_25], %25 {strides = array<i32>} : memref<1x8x2xf32, #tpu.memory_space<vmem>>, vector<1x8x2xf32>,
    } else {
    }
    %c0 = arith.constant 0 : index
    %c0_1 = arith.constant 0 : index
    %c0_2 = arith.constant 0 : index
    %3 = vector.load %arg3[%c0, %c0_1, %c0_2] : memref<2x4x18xbf16, #tpu.memory_space<vmem>>, vector<1x4x18xbf16>
    %4 = vector.shape_cast %3 : vector<1x4x18xbf16> to vector<4x18xbf16>
    %c0_3 = arith.constant 0 : index
    %c0_4 = arith.constant 0 : index
    %c0_5 = arith.constant 0 : index
    %5 = vector.load %arg2[%c0_3, %c0_4, %c0_5] : memref<2x18x128xbf16, #tpu.memory_space<vmem>>, vector<1x18x128xbf16>
    %6 = vector.shape_cast %5 : vector<1x18x128xbf16> to vector<18x128xbf16>
    %cst = arith.constant dense<0.000000e+00> : vector<4x128xf32>
    %7 = tpu.matmul %4, %6, %cst {dimension_numbers = #tpu.dot_dimension_numbers<[1], [0], [0], [1], [0, 0, 1, 1], [], []>} : vector<4x18xbf16>, vector<18x128xbf16>, vector<4x128xf32> -> vector<4x128xf32>
    %c1 = arith.constant 1 : index
    %c0_6 = arith.constant 0 : index
    %c0_7 = arith.constant 0 : index
    %8 = vector.load %arg3[%c1, %c0_6, %c0_7] : memref<2x4x18xbf16, #tpu.memory_space<vmem>>, vector<1x4x18xbf16>
    %9 = vector.shape_cast %8 : vector<1x4x18xbf16> to vector<4x18xbf16>
    %c1_8 = arith.constant 1 : index
    %c0_9 = arith.constant 0 : index
    %c0_10 = arith.constant 0 : index
    %10 = vector.load %arg2[%c1_8, %c0_9, %c0_10] : memref<2x18x128xbf16, #tpu.memory_space<vmem>>, vector<1x18x128xbf16>
    %11 = vector.shape_cast %10 : vector<1x18x128xbf16> to vector<18x128xbf16>
    %cst_11 = arith.constant dense<0.000000e+00> : vector<4x128xf32>
    %12 = tpu.matmul %9, %11, %cst_11 {dimension_numbers = #tpu.dot_dimension_numbers<[1], [0], [0], [1], [0, 0, 1, 1], [], []>} : vector<4x18xbf16>, vector<18x128xbf16>, vector<4x128xf32> -> vector<4x128xf32>
    %13 = tpu.concatenate %7, %12 in 0 : vector<4x128xf32>, vector<4x128xf32> -> vector<8x128xf32>
    %c0_12 = arith.constant 0 : index
    %c0_13 = arith.constant 0 : index
    %14 = vector.load %arg4[%c0_12, %c0_13] : memref<8x128xf32, #tpu.memory_space<vmem>>, vector<8x128xf32>
    tpu.vector_store %arg4[%c0_12, %c0_13], %13 {strides = array<i32>} : memref<8x128xf32, #tpu.memory_space<vmem>>, vector<8x128xf32>,
    %cst_14 = arith.constant dense<0.000000e+00> : vector<8xf32>
    %15 = vector.multi_reduction <add>, %13, %cst_14 [1] : vector<8x128xf32> to vector<8xf32>
    %16 = vector.shape_cast %15 : vector<8xf32> to vector<8x1xf32>
    %17 = arith.mulf %13, %13 : vector<8x128xf32>
    %cst_15 = arith.constant dense<0.000000e+00> : vector<8xf32>
    %18 = vector.multi_reduction <add>, %17, %cst_15 [1] : vector<8x128xf32> to vector<8xf32>
    %19 = vector.shape_cast %18 : vector<8xf32> to vector<8x1xf32>
    %c0_16 = arith.constant 0 : index
    %c0_17 = arith.constant 0 : index
    %c0_18 = arith.constant 0 : index
    %20 = vector.load %arg5[%c0_16, %c0_17, %c0_18] : memref<1x8x2xf32, #tpu.memory_space<vmem>>, vector<1x8x2xf32>
    %21 = tpu.concatenate %16, %19 in 1 : vector<8x1xf32>, vector<8x1xf32> -> vector<8x2xf32>
    %22 = vector.shape_cast %21 : vector<8x2xf32> to vector<1x8x2xf32>
    %23 = arith.addf %20, %22 : vector<1x8x2xf32>
    %c0_19 = arith.constant 0 : index
    %c0_20 = arith.constant 0 : index
    %c0_21 = arith.constant 0 : index
    %24 = vector.load %arg5[%c0_19, %c0_20, %c0_21] : memref<1x8x2xf32, #tpu.memory_space<vmem>>, vector<1x8x2xf32>
    tpu.vector_store %arg5[%c0_19, %c0_20, %c0_21], %23 {strides = array<i32>} : memref<1x8x2xf32, #tpu.memory_space<vmem>>, vector<1x8x2xf32>,
    return
  }
  func.func @transform_0(%arg0: i32, %arg1: i32) -> (i32, i32, i32) {
    %c2_i32 = arith.constant 2 : i32
    %0 = arith.muli %arg0, %c2_i32 : i32
    %1 = arith.addi %0, %arg1 : i32
    %c0_i32 = arith.constant 0 : i32
    %c0_i32_0 = arith.constant 0 : i32
    %c0_i32_1 = arith.constant 0 : i32
    return %c0_i32, %c0_i32_0, %1 : i32, i32, i32
  }
  func.func @transform_1(%arg0: i32, %arg1: i32) -> (i32, i32, i32) {
    %c0_i32 = arith.constant 0 : i32
    %c0_i32_0 = arith.constant 0 : i32
    %c0_i32_1 = arith.constant 0 : i32
    %c0_i32_2 = arith.constant 0 : i32
    return %c0_i32, %c0_i32_0, %c0_i32_1 : i32, i32, i32
  }
  func.func @transform_2(%arg0: i32, %arg1: i32) -> (i32, i32) {
    %c2_i32 = arith.constant 2 : i32
    %0 = arith.muli %arg0, %c2_i32 : i32
    %1 = arith.addi %0, %arg1 : i32
    %c0_i32 = arith.constant 0 : i32
    %c0_i32_0 = arith.constant 0 : i32
    return %c0_i32, %1 : i32, i32
  }
  func.func @transform_3(%arg0: i32, %arg1: i32) -> (i32, i32, i32) {
    %c0_i32 = arith.constant 0 : i32
    %c0_i32_0 = arith.constant 0 : i32
    %c0_i32_1 = arith.constant 0 : i32
    return %arg0, %c0_i32, %c0_i32_0 : i32, i32, i32
  }
}

</mosaic_0001>

<bundles_post_ra>
// kernel: tpu_custom_call.1
= control target key start
LH: loop header
LB: loop body
LE: loop exit
PB: predicated region body
PF: predicated region fallthrough
CT: control target
= control target key end

     0   :  { %s953_s0 = inlined_call_operand.vmem [shape: bf16[2,18,512], index: 0, kind: input, shape index: {}]   ;;  %s954_s1 = inlined_call_operand.vmem [shape: bf16[2,4,18], index: 1, kind: input, shape index: {}]   ;;  %s955_s2 = inlined_call_operand.hbm [shape: f32[8,512], index: 2, kind: output, shape index: {0}]   ;;  %s956_s3 = inlined_call_operand.vmem [shape: f32[2,8,2], index: 3, kind: output, shape index: {1}]  }
   0x1   :  { %957 = sst [smem:[#allocation6_spill]] %s953_s0 }
   0x2   :  { %9 = vsyncpa [#allocation4], 0 }
   0x3   :  { %11 = vsyncpa [#allocation4 + $0x1], 0  ;;  %s791_s12 = smov 0   ;;  %s793_s13 = smov 0  }
   0x4   :  { %s795_s14 = smov 0   ;;  %s797_s15 = smov 0  }
   0x5   :  { %s799_s16 = smov 0   ;;  %s801_s17 = smov 0  }
   0x6   :  { %s803_s18 = smov 0   ;;  %s805_s19 = smov 0  }
   0x7 LB: > { %s540_s20 = sadd.s32 4294967295, %s765_s19   ;;  %s26_s21 = sadd.s32 1, %s757_s17  ;;  %s765_s19 = sphi %s805_s19, %s17_s19   ;;  %s761_s18 = sphi %s803_s18, %s968_s18   ;;  %s757_s17 = sphi %s801_s17, %s967_s17   ;;  %s753_s16 = sphi %s799_s16, %s966_s16   ;;  %s749_s15 = sphi %s797_s15, %s965_s15   ;;  %s745_s14 = sphi %s795_s14, %s964_s14   ;;  %s741_s13 = sphi %s793_s13, %s963_s13   ;;  %s737_s12 = sphi %s791_s12, %s962_s12  }
   0x8   : > { %s29_s22 = sadd.s32 1, %s761_s18  ;;  %p27_p0 = scmp.ge.s32.totalorder %s26_s21, 2 }
   0x9   : > { %s542_s23 = sshll.u32 %s761_s18, 1  ;;  %s541_s24 = sadd.s32 4294967294, %s765_s19  }
   0xa   : > { %s34_s25 = sadd.s32 %s757_s17, %s542_s23  ;;  %s970_s21 = smov (%p27_p0, %s26_s21), 0 }
   0xb   : > { %s972_s22 = smov (!%p27_p0, %s29_s22), %s761_s18  ;;  %p47_p1 = scmp.ne.s32.totalorder %s745_s14, %s741_s13 }
   0xc   : > { %p48_p2 = scmp.eq.s32.totalorder %s765_s19, 0  ;;  %p31_p3 = scmp.ge.s32.totalorder %s972_s22, 2 }
   0xd   : > { %p102_p4 = scmp.eq.s32.totalorder %s540_s20, 3  ;;  %p107_p6 = scmp.ne.s32.totalorder %s741_s13, %s737_s12 }
   0xe   : > { %p843_p5 = por %p48_p2, %p47_p1  ;;  %s974_s22 = smov (%p31_p3, %s972_s22), 0 }
   0xf   : > { %p851_p7 = por %p102_p4, %p47_p1  ;;  %p108_p8 = scmp.eq.s32.totalorder %s541_s24, 3 }
  0x10   : > { %s543_s28 = sshll.u32 %s974_s22, 1  ;;  %s40_s5 = sadd.s32 1, %s745_s14 }
  0x11   : > { %s36_s29 = sadd.s32 %s543_s28, %s970_s21  ;;  %p857_p9 = por %p108_p8, %p107_p6 }
  0x12   : > { %s37_s4 = ssub.s32 %s34_s25, %s36_s29  ;;  %p547_p11 = scmp.ge.s32.totalorder %s765_s19, 4 }
  0x13   : > { %p38_p10 = scmp.eq.s32.totalorder %s37_s4, 0 }
  0x14   : > { %153 = sbr.rel (%p547_p11) target bundleno = 41 (0x29), region = 20 }
  0x15   : > { %s863_s6 = scalar_select %p38_p10, %s745_s14, %s40_s5  }
  0x1b   : > { %156 = sbr.rel (!%p843_p5) target bundleno = 41 (0x29), region = 24  ;;  %s158_s7 = sand.u32 (%p843_p5), 1, %s745_s14  }
  0x1c   : > { %s549_s8 = sshll.u32 (%p843_p5), %s34_s25, 2  ;;  %s591_s9 = smul.u32 (%p843_p5), 24, %s158_s7 }
  0x1d   : > { %s961_s0 = sld [smem:[#allocation6_spill]] (%p843_p5) }
  0x1e   : > { %s160_s23 = scalar_lea.vmem (%p843_p5), [#allocation2], %s591_s9 }
  0x23   : > { %s164_s20 = scalar_lea.vmem %s961_s0, %s549_s8 }
  0x24   : > { %v180_v0 = vld [vmem:[%s164_s20] sm:$0xf]  ;;  %v182_v1 = vld [vmem:[%s164_s20 + $0x10] sm:$0xf] }
  0x25   : > { %v184_v2 = vld [vmem:[%s164_s20 + $0x20] sm:$0xf]  ;;  %v186_v3 = vld [vmem:[%s164_s20 + $0x30] sm:$0xf]  ;;  %181 = vst [vmem:[%s160_s23] sm:$0xf] %v180_v0 }
  0x26   : > { %v188_v4 = vld [vmem:[%s164_s20 + $0x40] sm:$0xf]  ;;  %183 = vst [vmem:[%s160_s23 + $0x4] sm:$0xf] %v182_v1  ;;  %185 = vst [vmem:[%s160_s23 + $0x8] sm:$0xf] %v184_v2 }
  0x27   : > { %187 = vst [vmem:[%s160_s23 + $0xc] sm:$0xf] %v186_v3  ;;  %189 = vst [vmem:[%s160_s23 + $0x10] sm:$0xf] %v188_v4  ;;  %v190_v5 = vld [vmem:[%s164_s20 + $0x50] sm:$0xf] }
  0x28   : > { %191 = vst [vmem:[%s160_s23 + $0x14] sm:$0xf] %v190_v5 }
  0x29 PF: > { %p550_p12 = scmp.ge.s32.totalorder %s765_s19, 1  ;;  %p225_p13 = scmp.lt.s32.totalorder %s765_s19, 5 }
  0x2b   : > { %p226_p0 = pnand %p550_p12, %p225_p13 }
  0x2c   : > { %s875_s24 = sand.u32 (!%p226_p0), 1, %s741_s13   ;;  %p263_p1 = scmp.lt.s32.totalorder (!%p226_p0), %s753_s16, 1 }
  0x2d   : > { %229 = sbr.rel (%p226_p0) target bundleno = 434 (0x1b2), region = 65  ;;  %s551_s26 = sshll.u32 (!%p226_p0), %s875_s24, 3 }
  0x2e   : > { %s592_s25 = smul.u32 (!%p226_p0), 24, %s875_s24  ;;  %s886_s9 = scalar_lea.vmem (!%p226_p0), [#allocation3], %s551_s26 }
  0x2f   : > { %p553_p2 = scmp.ne.s32.totalorder (!%p226_p0), %s749_s15, 0 }
  0x30   : > { %s234_s8 = scalar_lea.vmem (!%p226_p0), [#allocation2], %s592_s25 }
  0x34   : > { %s264_s28 = scalar_select %p263_p1, %s753_s16, 1 }
  0x35   : > { %271 = sbr.rel (%p553_p2) target bundleno = 60 (0x3c), region = 73  ;;  %vm272_vm0 = vcmask (!%p553_p2), 15360   ;;  %v767_v6 = vmov (!%p553_p2), 0.0  }
  0x36   : > { %s552_s29 = sshll.u32 %s264_s28, 3 }
  0x37   : > { %s884_s7 = scalar_lea.vmem %s956_s3, %s552_s29 }
  0x38   : > { %273 = vst.msk [vmem:[%s884_s7] sm:$0xff] (!%p553_p2), %vm272_vm0, %v767_v6 }
  0x3c PF: > { %v667_v7 = vld [vmem:[%s234_s8] sm:$0xff]   ;;  %v768_v8 = vmov 0.0   ;;  %v668_v9 = vld [vmem:[%s234_s8 + $0xc] sm:$0xff]   ;;  %vm291_vm1 = vcmask 1040384   ;;  %vm769_vm2 = vmmov 0   ;;  %vm287_vm3 = vcmask 146432  }
  0x3d   : > { %575 = vmatprep.subr.bf16.mxu0 %v768_v8  ;;  %583 = vmatprep.subr.bf16.mxu1 %v768_v8  ;;  %v669_v10 = vld [vmem:[%s234_s8 + $0x8] ss:$0 sps:$4 sm:$0x11]   ;;  %v670_v11 = vld [vmem:[%s234_s8 + $0x14] ss:$0 sps:$4 sm:$0x11]  }
  0x3e   : > { %576 = vmatpush3.bf16.msra.mxu0 %v667_v7  ;;  %584 = vmatpush3.bf16.msra.mxu1 %v668_v9  ;;  %v293_v12 = vsel %vm291_vm1, %v669_v10, 0  ;;  %v354_v13 = vsel %vm291_vm1, %v670_v11, 0  ;;  %v274_v14 = vld [vmem:[%s954_s1] sm:$0x3]  ;;  %v557_v15 = vld [vmem:[%s954_s1 + $0x2] sm:$0x3] }
  0x3f   : > { %577 = vmatprep.subr.bf16.mxu0 %v768_v8  ;;  %585 = vmatprep.subr.bf16.mxu1 %v768_v8  ;;  %vm399_vm4 = vcmask 1043456   ;;  %s565_s25 = sshll.u32 %s753_s16, 1  ;;  %s433_s29 = sshll.u32 %s886_s9, 4  ;;  %s434_s29 = int_to_ptr.vmem [resolvable:$true] %s433_s29 }
  0x40   : > { %579 = vmatprep.mubr.msk.bf16.mxu0 %vm769_vm2, %v768_v8  ;;  %587 = vmatprep.mubr.msk.bf16.mxu1 %vm769_vm2, %v768_v8  ;;  %s426_s26 = sadd.s32 %s749_s15, %s565_s25  ;;  %s414_s10 = scalar_lea.sflag [#allocation4], %s875_s24 }
  0x41   : > { %s566_s28 = sshll.u32 %s426_s26, 7  ;;  %s671_s11 = scalar_lea.vmem %s434_s29, 128 }
  0x42   : > { %578 = vmatpush3.bf16.msra.mxu0 %v293_v12  ;;  %586 = vmatpush3.bf16.msra.mxu1 %v354_v13  ;;  %s903_s8 = scalar_lea.hbm %s955_s2, %s566_s28  ;;  %p672_p3 = scmp.ne.s32.totalorder %s434_s29, %s671_s11 }
  0x43   : > { %s770_s20 = smov [#allocation3]  }
  0x44   : > { %p673_p4 = pnand %p672_p3, %p851_p7  ;;  %s675_s23 = sshll.u32 %s770_s20, 4  ;;  %s676_s23 = int_to_ptr.vmem [resolvable:$false] %s675_s23 }
  0x45   : > { %580 = vmatmul.mubr.msk.bf16.vlgmr.msra.gmra.mrb[0].mxu0 %vm287_vm3, %v274_v14  ;;  %588 = vmatmul.mubr.msk.bf16.vlgmr.msra.gmra.mrb[0].mxu1 %vm287_vm3, %v557_v15  ;;  %s677_s0 = scalar_lea.vmem %s676_s23, 256  ;;  %p678_p6 = scmp.lt.s32.totalorder %s434_s29, %s676_s23 }
  0x46   : > { %p674_p5 = pneg %p673_p4  ;;  %p679_p8 = scmp.lt.s32.totalorder %s677_s0, %s671_s11 }
  0x48   : > { %p680_p10 = por %p679_p8, %p678_p6 }
  0x4a   : > { %p681_p11 = pnand %p680_p10, %p674_p5 }
 0x118   : > { %v329_v16 = vpop.f32.mrb[0].mxu0  ;;  %v390_v17 = vpop.f32.mrb[0].mxu1 }
 0x119   : > { %v581_v18 = vpop.f32.mrb[1].mxu0  ;;  %v397_v19 = vrot.slane %v390_v17, 4  ;;  %v589_v20 = vpop.f32.mrb[1].mxu1 }
 0x11a   : > { %v332_v21 = vpop.f32.mrb[2].mxu0  ;;  %v393_v22 = vpop.f32.mrb[2].mxu1 }
 0x11b   : > { %v582_v23 = vpop.f32.mrb[3].mxu0  ;;  %v590_v24 = vpop.f32.mrb[3].mxu1  ;;  %v400_v25 = vsel %vm399_vm4, %v329_v16, %v397_v19 }
 0x11c   : > { %402 = vadd.xlane.f32.xlu0 %v400_v25  ;;  %401 = vst [vmem:[%s886_s9] sm:$0xff] %v400_v25  ;;  %v404_v26 = vmul.f32 %v400_v25, %v400_v25 }
 0x120   : > { %405 = vadd.xlane.f32.xlu0 %v404_v26 }
 0x121   : > { %684 = shalt.err (!%p681_p11)
}
 0x122   : > { %s685_s15 = scalar_lea.hbm %s903_s8, 128  ;;  %s689_s9 = scalar_lea.hbm %s955_s2, 512 }
 0x123   : > { %p686_p12 = scmp.ne.s32.totalorder %s903_s8, %s685_s15  ;;  %p690_p1 = scmp.lt.u32.totalorder %s903_s8, %s955_s2 }
 0x124   : > { %p691_p2 = scmp.lt.u32.totalorder %s689_s9, %s685_s15  ;;  %p693_p4 = scmp.lt.u32.totalorder %s685_s15, %s903_s8 }
 0x125   : > { %p687_p13 = pnand %p686_p12, %p851_p7 }
 0x126   : > { %p692_p3 = por %p691_p2, %p690_p1 }
 0x127   : > { %p688_p0 = pneg %p687_p13 }
 0x128   : > { %p694_p5 = por %p693_p4, %p692_p3 }
 0x12a   : > { %p695_p6 = pnand %p694_p5, %p688_p0 }
 0x12c   : > { %698 = shalt.err (!%p695_p6)
}
 0x12d   : > { %593 = dma.vmem_to_hbm [thread:$0]  (%p851_p7), %s434_s29, 128, %s903_s8, %s414_s10   ;;  %vm408_vm5 = vcmask 7168   ;;  %v407_v28 = vld [vmem:[%s884_s7] sm:$0xff]  ;;  %vm411_vm6 = vcmask 15360  }
 0x1a9   : > { %v403_v27 = vpop.xlane.xlu0 %402 }
 0x1ad   : > { %v406_v29 = vpop.xlane.xlu0 %405 }
 0x1ae   : > { %v409_v30 = vsel %vm408_vm5, %v403_v27, %v406_v29 }
 0x1af   : > { %v410_v31 = vadd.f32 %v409_v30, %v407_v28 }
 0x1b1   : > { %412 = vst.msk [vmem:[%s884_s7] sm:$0xff] %vm411_vm6, %v410_v31 }
 0x1b2 PF: > { %p599_p8 = scmp.ge.s32.totalorder %s765_s19, 2  ;;  %s448_s0 = sand.u32 1, %s737_s12  }
 0x1b3   : > { %s449_s27 = scalar_lea.sflag [#allocation4], %s448_s0 }
 0x1b4   : > { %p596_p10 = pnand %p599_p8, %p857_p9 }
 0x1b6   : > { %732 = dma.done.wait (!%p596_p10), %s449_s27, 128  }
 0x1b7   : > { %734 = vsyncadd (!%p596_p10), %s449_s27, 4294967168  ;;  %s17_s19 = sadd.s32 1, %s765_s19   ;;  %s962_s12 = smov %s741_s13 }
 0x1b8   : > { %p14_p7 = scmp.ge.s32.totalorder %s17_s19, 6   ;;  %s963_s13 = smov %s745_s14 }
 0x1b9   : > { %s964_s14 = smov %s863_s6  ;;  %s965_s15 = smov %s757_s17 }
 0x1ba   : > { %s966_s16 = smov %s761_s18  ;;  %s967_s17 = smov %s970_s21 }
 0x1bb   : > { %s968_s18 = smov %s974_s22  ;;  %16 = sbr.rel (!%p14_p7) target bundleno = 7 (0x7), region = 127 }
 0x1c2   :  { %461 = vsyncpa [#allocation4], 1 }
 0x1c3   :  { %463 = vsyncpa [#allocation4 + $0x1], 1 }

</bundles_post_ra>
